<compile_context>
chip_gen: v5e
topology: v5e:2x2
jax: 0.10.0
libtpu: 0.0.40
codegen_flags: <defaults>
</compile_context>

<pallas_src>
import functools

import jax
import jax.numpy as jnp
from jax import lax
from jax.experimental import pallas as pl
from jax.experimental.pallas import tpu as pltpu


LAYER_CFG = ((64, 3, 1), (128, 4, 2), (256, 23, 2), (512, 3, 2))  # (width, blocks, first stride)


def _round_up(x, m):
    return (x + m - 1) // m * m


def _pick_tile(p, choices=(512, 256, 128)):
    for c in choices:
        if p % c == 0:
            return c
    return 128


# ----------------------------------------------------------------------------
# Pallas matmul kernel: bf16 x bf16 -> f32 acc, fused bias [+ residual] [+ ReLU]
# ----------------------------------------------------------------------------
def _matmul_kernel(*refs, nk, relu, has_res):
    if has_res:
        x_ref, w_ref, b_ref, r_ref, o_ref, acc_ref = refs
    else:
        x_ref, w_ref, b_ref, o_ref, acc_ref = refs
    k = pl.program_id(2)

    @pl.when(k == 0)
    def _init():
        acc_ref[...] = jnp.zeros_like(acc_ref)

    acc_ref[...] += jnp.dot(x_ref[...], w_ref[...],
                            preferred_element_type=jnp.float32)

    @pl.when(k == nk - 1)
    def _fin():
        r = acc_ref[...] + b_ref[...]
        if has_res:
            r = r + r_ref[...]
        if relu:
            r = jnp.maximum(r, 0.0)
        o_ref[...] = r.astype(o_ref.dtype)


@functools.lru_cache(maxsize=None)
def _matmul_call(Mp, Kp, Np, tm, tk, tn, relu, has_res):
    nk = Kp // tk
    kernel = functools.partial(_matmul_kernel, nk=nk, relu=relu, has_res=has_res)
    in_specs = [
        pl.BlockSpec((tm, tk), lambda i, j, k: (i, k)),
        pl.BlockSpec((tk, tn), lambda i, j, k: (k, j)),
        pl.BlockSpec((1, tn), lambda i, j, k: (0, j)),
    ]
    if has_res:
        in_specs.append(pl.BlockSpec((tm, tn), lambda i, j, k: (i, j)))
    return pl.pallas_call(
        kernel,
        out_shape=jax.ShapeDtypeStruct((Mp, Np), jnp.float32),
        grid_spec=pltpu.PrefetchScalarGridSpec(
            num_scalar_prefetch=0,
            grid=(Mp // tm, Np // tn, nk),
            in_specs=in_specs,
            out_specs=pl.BlockSpec((tm, tn), lambda i, j, k: (i, j)),
            scratch_shapes=[pltpu.VMEM((tm, tn), jnp.float32)],
        ),
        compiler_params=pltpu.CompilerParams(
            dimension_semantics=("parallel", "parallel", "arbitrary")),
    )


def matmul_prepared(x, wm, b, relu=False, res=None):
    """x:(M,K) f32 @ wm:(Kp,Np) bf16 (pre-folded/padded) + b:(1,N) [+ res:(M,N)] [+ ReLU]."""
    M, K = x.shape
    Kp, Np = wm.shape
    N = b.shape[-1]
    assert Kp == _round_up(K, 128) and Np == _round_up(N, 128)

    if M >= 256:
        tm = 256
    elif M >= 128:
        tm = 128
    else:
        tm = _round_up(M, 16)          # bf16 sublane packing friendly
    Mp = _round_up(M, tm)
    tk = _pick_tile(Kp)
    tn = _pick_tile(Np)
    # keep >=2 blocks on a parallel axis when M collapses to one tile (v7x: feed both TCs)
    if Mp == tm and tn > 256 and Np % 256 == 0:
        tn = 256

    xp = jnp.pad(x.astype(jnp.bfloat16), ((0, Mp - M), (0, Kp - K)))
    bp = jnp.pad(b.astype(jnp.float32), ((0, 0), (0, Np - N)))
    args = [xp, wm, bp]
    if res is not None:
        args.append(jnp.pad(res.astype(jnp.float32), ((0, Mp - M), (0, Np - N))))
    out = _matmul_call(Mp, Kp, Np, tm, tk, tn, bool(relu), res is not None)(*args)
    return out[:M, :N]


# ----------------------------------------------------------------------------
# Conv lowering (im2col glue) on top of the Pallas matmul
# ----------------------------------------------------------------------------
def im2col(x, kh, kw, stride, pad):
    # TODO(synk): 3x3 convs still materialize the kh*kw-expanded patch tensor; an implicit GEMM
    #             (taps as an extra reduction grid axis) would cut that HBM traffic further.
    B, H, W, C = x.shape
    if pad > 0:
        x = jnp.pad(x, ((0, 0), (pad, pad), (pad, pad), (0, 0)))
    Ho = (H + 2 * pad - kh) // stride + 1
    Wo = (W + 2 * pad - kw) // stride + 1
    cols = []
    for i in range(kh):
        for j in range(kw):
            cols.append(x[:, i:i + (Ho - 1) * stride + 1:stride,
                             j:j + (Wo - 1) * stride + 1:stride, :])
    patches = jnp.concatenate(cols, axis=-1)          # (B, Ho, Wo, kh*kw*C), tap-major
    return patches.reshape(B * Ho * Wo, kh * kw * C), Ho, Wo


def conv_prepared(x, p, kh, kw, stride, pad, relu, res=None):
    """Conv2d (+folded BN) via im2col + Pallas matmul; optional fused residual + ReLU."""
    cols, Ho, Wo = im2col(x, kh, kw, stride, pad)
    y = matmul_prepared(cols, p["wm"], p["b"], relu=relu, res=res)
    return y.reshape(x.shape[0], Ho, Wo, y.shape[-1])


def maxpool_3x3_s2(x):
    # TODO(synk): 3x3/2 max-pool kept as plain-JAX reduce_window glue (cheap, non-hot-path).
    return lax.reduce_window(x, -jnp.inf, lax.max,
                             (1, 3, 3, 1), (1, 2, 2, 1),
                             ((0, 0), (1, 1), (1, 1), (0, 0)))


# ----------------------------------------------------------------------------
# ECA: Pallas channel-scale kernel; tiny k=3 channel conv on the pooled vector in JAX glue
# ----------------------------------------------------------------------------
def _eca_scale_kernel(x_ref, g_ref, o_ref):
    o_ref[...] = x_ref[...] * g_ref[...]            # (1,HW,C) * (1,1,C)


@functools.lru_cache(maxsize=None)
def _eca_scale_call(B, HW, C):
    return pl.pallas_call(
        _eca_scale_kernel,
        out_shape=jax.ShapeDtypeStruct((B, HW, C), jnp.float32),
        grid=(B,),
        in_specs=[pl.BlockSpec((1, HW, C), lambda b: (b, 0, 0)),
                  pl.BlockSpec((1, 1, C), lambda b: (b, 0, 0))],
        out_specs=pl.BlockSpec((1, HW, C), lambda b: (b, 0, 0)),
        compiler_params=pltpu.CompilerParams(dimension_semantics=("parallel",)),
    )


def eca(x, w3):
    """ECA channel attention (k_size=3): pool -> conv1d -> sigmoid -> scale."""
    # TODO(synk): the k=3 cross-channel conv + sigmoid on the pooled (B,C) vector is plain-JAX
    #             glue (needs cross-lane shifts); the O(B*HW*C) scaling is the Pallas kernel.
    B, H, W, C = x.shape
    p = jnp.mean(x, axis=(1, 2))                               # global avg pool -> (B, C)
    pz = jnp.pad(p, ((0, 0), (1, 1)))                          # zero pad like conv1d(pad=1)
    y = w3[0] * pz[:, :-2] + w3[1] * pz[:, 1:-1] + w3[2] * pz[:, 2:]
    gate = jax.nn.sigmoid(y)                                   # (B, C)
    out = _eca_scale_call(B, H * W, C)(x.reshape(B, H * W, C), gate.reshape(B, 1, C))
    return out.reshape(B, H, W, C)


# ----------------------------------------------------------------------------
# Network forward (stem / bottleneck / head each jit'ed; identical blocks share compiles)
# ----------------------------------------------------------------------------
@jax.jit
def _stem_jit(x_nchw, conv1):
    x = jnp.transpose(x_nchw.astype(jnp.float32), (0, 2, 3, 1))      # NCHW -> NHWC
    x = conv_prepared(x, conv1, 7, 7, 2, 3, relu=True)               # conv1 + bn1 + relu
    return maxpool_3x3_s2(x)                                         # maxpool 3x3/2


@functools.partial(jax.jit, static_argnums=(2,))
def _bottleneck_jit(x, p, stride):
    out = conv_prepared(x, p["c1"], 1, 1, 1, 0, relu=True)           # 1x1
    out = conv_prepared(out, p["c2"], 3, 3, stride, 1, relu=True)    # 3x3 (stride here, v1.5)
    if "ds" in p:
        identity = conv_prepared(x, p["ds"], 1, 1, stride, 0, relu=False)
    else:
        identity = x
    B, Ho, Wo, C = identity.shape
    # residual add + ReLU fused into the c3 GEMM epilogue (no separate elementwise kernel)
    return conv_prepared(out, p["c3"], 1, 1, 1, 0, relu=True,
                         res=identity.reshape(B * Ho * Wo, C))


@jax.jit
def _head_jit(x, eca_w, pool_e, pool_x, fc):
    e = eca(x, eca_w)                                                # ECA channel attention
    # Conv2d(4096, 512, 3, pad=1) over cat([eca, x], dim=1) WITHOUT materializing the concat:
    # the two Cin halves accumulate through the fused-residual matmul epilogue.
    t = conv_prepared(e, pool_e, 3, 3, 1, 1, relu=False)             # eca half (zero bias)
    B, Ho, Wo, Cp = t.shape
    p = conv_prepared(x, pool_x, 3, 3, 1, 1, relu=True,
                      res=t.reshape(B * Ho * Wo, Cp))                # + x half + bias + ReLU
    p = jnp.mean(p, axis=(1, 2))                                     # AdaptiveAvgPool2d((1,1))
    return matmul_prepared(p, fc["wm"], fc["b"], relu=False)         # Linear(512, 172)


def forward(params, x_nchw):
    x = _stem_jit(x_nchw, params["conv1"])
    for li, blocks in enumerate(params["layers"]):                   # layer1..layer4
        s0 = LAYER_CFG[li][2]
        for i, blk in enumerate(blocks):
            x = _bottleneck_jit(x, blk, s0 if i == 0 else 1)
    return _head_jit(x, params["eca_w"], params["pool_e"], params["pool_x"], params["fc"])


# ----------------------------------------------------------------------------
# Deterministic synthetic parameters (ResNet-101 shapes), pre-folded / pre-packed for the MXU
# ----------------------------------------------------------------------------
def _pack_conv(w, b):
    """(kh,kw,cin,cout) conv weight -> 128-padded (Kp,Np) bf16 matmul matrix + f32 bias."""
    kh, kw, cin, cout = w.shape
    K = kh * kw * cin
    Kp, Np = _round_up(K, 128), _round_up(cout, 128)
    wm = jnp.pad(w.reshape(K, cout), ((0, Kp - K), (0, Np - cout))).astype(jnp.bfloat16)
    return {"wm": wm, "b": b.reshape(1, cout).astype(jnp.float32)}


def _fold_conv(key, kh, kw, cin, cout):
    """Random conv + eval-mode BatchNorm, folded into the packed matmul weight/bias."""
    k1, k2, k3 = jax.random.split(key, 3)
    std = (2.0 / (kh * kw * cin)) ** 0.5
    w = jax.random.normal(k1, (kh, kw, cin, cout), jnp.float32) * std
    s = 1.0 + 0.05 * jax.random.normal(k2, (cout,), jnp.float32)      # BN scale
    b = 0.05 * jax.random.normal(k3, (cout,), jnp.float32)            # BN shift (folded bias)
    return _pack_conv(w * s[None, None, None, :], b)


def _bottleneck_init(key, cin, width, stride):
    ks = jax.random.split(key, 4)
    p = {
        "c1": _fold_conv(ks[0], 1, 1, cin, width),
        "c2": _fold_conv(ks[1], 3, 3, width, width),
        "c3": _fold_conv(ks[2], 1, 1, width, width * 4),
    }
    if stride != 1 or cin != width * 4:
        p["ds"] = _fold_conv(ks[3], 1, 1, cin, width * 4)
    return p


def init_params(key):
    counter = [0]

    def nk():
        counter[0] += 1
        return jax.random.fold_in(key, counter[0])

    params = {"conv1": _fold_conv(nk(), 7, 7, 3, 64)}
    layers = []
    cin = 64
    for width, nblocks, stride in LAYER_CFG:                          # ResNet-101 config
        blocks = []
        for i in range(nblocks):
            blocks.append(_bottleneck_init(nk(), cin, width, stride if i == 0 else 1))
            cin = width * 4
        layers.append(blocks)
    params["layers"] = layers

    params["eca_w"] = 0.3 * jax.random.normal(nk(), (3,), jnp.float32)   # conv1d k=3, no bias

    std = (2.0 / (3 * 3 * 4096)) ** 0.5
    pool_w = jax.random.normal(nk(), (3, 3, 4096, 512), jnp.float32) * std
    pool_b = 0.05 * jax.random.normal(nk(), (512,), jnp.float32)
    # split Cin so cat([eca, x], dim=1) never has to be materialized
    params["pool_e"] = _pack_conv(pool_w[:, :, :2048, :], jnp.zeros((512,), jnp.float32))
    params["pool_x"] = _pack_conv(pool_w[:, :, 2048:, :], pool_b)

    fc_w = jax.random.normal(nk(), (512, 172), jnp.float32) * (1.0 / 512) ** 0.5
    fc_b = 0.05 * jax.random.normal(nk(), (172,), jnp.float32)
    params["fc"] = _pack_conv(fc_w.reshape(1, 1, 512, 172), fc_b)
    return params


if __name__ == "__main__":
    root = jax.random.PRNGKey(0)
    pkey, xkey = jax.random.split(root)
    params = init_params(pkey)
    # Small input consistent with the module: NCHW, 3 channels (ResNet stem).
    x = jax.random.normal(xkey, (2, 3, 32, 32), jnp.float32)
    y = forward(params, x)
    y = jax.block_until_ready(y)
    assert y.shape == (2, 172), y.shape
    assert y.dtype == jnp.float32, y.dtype
    print("KERNEL_OK")
</pallas_src>

<mosaic_0001>
module attributes {stable_mosaic.version = 11 : i64} {
  func.func @_matmul_kernel(%arg0: i32, %arg1: i32, %arg2: i32, %arg3: memref<256x256xbf16, #tpu.memory_space<vmem>>, %arg4: memref<256x128xbf16, #tpu.memory_space<vmem>>, %arg5: memref<1x128xf32, #tpu.memory_space<vmem>>, %arg6: memref<256x128xf32, #tpu.memory_space<vmem>>, %arg7: memref<256x128xf32, #tpu.memory_space<vmem>>) attributes {dimension_semantics = [#tpu.dimension_semantics<parallel>, #tpu.dimension_semantics<parallel>, #tpu.dimension_semantics<arbitrary>], iteration_bounds = array<i64: 2, 1, 1>, scalar_prefetch = 0 : i64, scratch_operands = 1 : i64, tpu.core_type = #tpu.core_type<tc>, window_params = [{transform_indices = @transform_0, window_bounds = array<i64: 256, 256>}, {transform_indices = @transform_1, window_bounds = array<i64: 256, 128>}, {transform_indices = @transform_2, window_bounds = array<i64: 1, 128>}, {transform_indices = @transform_3, window_bounds = array<i64: 256, 128>}]} {
    %c0_i32 = arith.constant 0 : i32
    %0 = arith.cmpi eq, %arg2, %c0_i32 : i32
    %1 = arith.extui %0 : i1 to i32
    %c0_i32_0 = arith.constant 0 : i32
    %2 = arith.cmpi ne, %1, %c0_i32_0 : i32
    scf.if %2 {
      %cst_10 = arith.constant 0.000000e+00 : f32
      %12 = vector.broadcast %cst_10 : f32 to vector<256x128xf32>
      %c0_11 = arith.constant 0 : index
      %c0_12 = arith.constant 0 : index
      %13 = vector.load %arg7[%c0_11, %c0_12] : memref<256x128xf32, #tpu.memory_space<vmem>>, vector<256x128xf32>
      tpu.vector_store %arg7[%c0_11, %c0_12], %12 {strides = array<i32>} : memref<256x128xf32, #tpu.memory_space<vmem>>, vector<256x128xf32>,
    } else {
    }
    %c0 = arith.constant 0 : index
    %c0_1 = arith.constant 0 : index
    %3 = vector.load %arg7[%c0, %c0_1] : memref<256x128xf32, #tpu.memory_space<vmem>>, vector<256x128xf32>
    %c0_2 = arith.constant 0 : index
    %c0_3 = arith.constant 0 : index
    %4 = vector.load %arg3[%c0_2, %c0_3] : memref<256x256xbf16, #tpu.memory_space<vmem>>, vector<256x256xbf16>
    %c0_4 = arith.constant 0 : index
    %c0_5 = arith.constant 0 : index
    %5 = vector.load %arg4[%c0_4, %c0_5] : memref<256x128xbf16, #tpu.memory_space<vmem>>, vector<256x128xbf16>
    %cst = arith.constant dense<0.000000e+00> : vector<256x128xf32>
    %6 = tpu.matmul %4, %5, %cst {dimension_numbers = #tpu.dot_dimension_numbers<[1], [0], [0], [1], [0, 0, 1, 1], [], []>} : vector<256x256xbf16>, vector<256x128xbf16>, vector<256x128xf32> -> vector<256x128xf32>
    %7 = arith.addf %3, %6 : vector<256x128xf32>
    %c0_6 = arith.constant 0 : index
    %c0_7 = arith.constant 0 : index
    %8 = vector.load %arg7[%c0_6, %c0_7] : memref<256x128xf32, #tpu.memory_space<vmem>>, vector<256x128xf32>
    tpu.vector_store %arg7[%c0_6, %c0_7], %7 {strides = array<i32>} : memref<256x128xf32, #tpu.memory_space<vmem>>, vector<256x128xf32>,
    %c0_i32_8 = arith.constant 0 : i32
    %9 = arith.cmpi eq, %arg2, %c0_i32_8 : i32
    %10 = arith.extui %9 : i1 to i32
    %c0_i32_9 = arith.constant 0 : i32
    %11 = arith.cmpi ne, %10, %c0_i32_9 : i32
    scf.if %11 {
      %c0_10 = arith.constant 0 : index
      %c0_11 = arith.constant 0 : index
      %12 = vector.load %arg7[%c0_10, %c0_11] : memref<256x128xf32, #tpu.memory_space<vmem>>, vector<256x128xf32>
      %c0_12 = arith.constant 0 : index
      %c0_13 = arith.constant 0 : index
      %13 = vector.load %arg5[%c0_12, %c0_13] : memref<1x128xf32, #tpu.memory_space<vmem>>, vector<1x128xf32>
      %14 = vector.broadcast %13 : vector<1x128xf32> to vector<256x128xf32>
      %15 = arith.addf %12, %14 : vector<256x128xf32>
      %cst_14 = arith.constant 0.000000e+00 : f32
      %16 = vector.broadcast %cst_14 : f32 to vector<256x128xf32>
      %17 = arith.maximumf %15, %16 : vector<256x128xf32>
      %c0_15 = arith.constant 0 : index
      %c0_16 = arith.constant 0 : index
      %18 = vector.load %arg6[%c0_15, %c0_16] : memref<256x128xf32, #tpu.memory_space<vmem>>, vector<256x128xf32>
      tpu.vector_store %arg6[%c0_15, %c0_16], %17 {strides = array<i32>} : memref<256x128xf32, #tpu.memory_space<vmem>>, vector<256x128xf32>,
    } else {
    }
    return
  }
  func.func @transform_0(%arg0: i32, %arg1: i32, %arg2: i32) -> (i32, i32) {
    %c0_i32 = arith.constant 0 : i32
    return %arg0, %arg2 : i32, i32
  }
  func.func @transform_1(%arg0: i32, %arg1: i32, %arg2: i32) -> (i32, i32) {
    %c0_i32 = arith.constant 0 : i32
    return %arg2, %arg1 : i32, i32
  }
  func.func @transform_2(%arg0: i32, %arg1: i32, %arg2: i32) -> (i32, i32) {
    %c0_i32 = arith.constant 0 : i32
    %c0_i32_0 = arith.constant 0 : i32
    return %c0_i32, %arg1 : i32, i32
  }
  func.func @transform_3(%arg0: i32, %arg1: i32, %arg2: i32) -> (i32, i32) {
    %c0_i32 = arith.constant 0 : i32
    return %arg0, %arg1 : i32, i32
  }
}

</mosaic_0001>

<bundles_post_ra>
// kernel: _stem_jit.1
= control target key start
LH: loop header
LB: loop body
LE: loop exit
PB: predicated region body
PF: predicated region fallthrough
CT: control target
= control target key end

     0   :  { %s1486_s12 = smov 0   ;;  %s1488_s13 = smov 0   ;;  %s1714_s0 = inlined_call_operand.vmem [shape: bf16[512,256], index: 0, kind: input, shape index: {}]   ;;  %s1715_s1 = inlined_call_operand.vmem [shape: bf16[256,128], index: 1, kind: input, shape index: {}]   ;;  %s1716_s2 = inlined_call_operand.vmem [shape: f32[1,128], index: 2, kind: input, shape index: {}]   ;;  %s1717_s3 = inlined_call_operand.vmem [shape: f32[512,128], index: 3, kind: output, shape index: {}]  }
   0x1   :  { %s1490_s14 = smov 0  }
   0x2 LB: > { %s32_s15 = sadd.s32 1, %s1460_s13  ;;  %p1152_p0 = scmp.ge.s32.totalorder %s1464_s14, 1  ;;  %s1464_s14 = sphi %s1490_s14, %s13_s14   ;;  %s1460_s13 = sphi %s1488_s13, %s1719_s13   ;;  %s1456_s12 = sphi %s1486_s12, %s1718_s12  }
   0x3   : > { %p34_p1 = scmp.ge.s32.totalorder %s32_s15, 2  ;;  %p191_p2 = scmp.lt.s32.totalorder %s1464_s14, 3 }
   0x5   : > { %s1721_s15 = smov (%p34_p1, %s32_s15), 0  ;;  %p192_p3 = pnand %p1152_p0, %p191_p2 }
   0x6   : > { %s1153_s28 = sshll.u32 (!%p192_p3), %s1456_s12, 5 }
   0x7   : > { %195 = sbr.rel (%p192_p3) target bundleno = 304 (0x130), region = 32  ;;  %p236_p4 = scmp.lt.s32.totalorder (!%p192_p3), %s1153_s28, 63 }
   0xc   : > { %v1392_v0 = vld [vmem:[%s1715_s1 + $0x38] sm:$0xff]  ;;  %v1391_v2 = vld [vmem:[%s1715_s1 + $0x30] sm:$0xff]  ;;  %v1390_v4 = vld [vmem:[%s1715_s1 + $0x28] sm:$0xff]  ;;  %s1723_s28 = smov (!%p236_p4, %s1153_s28), 63 }
   0xd   : > { %v1400_v1 = vld [vmem:[%s1715_s1 + $0x78] sm:$0xff]  ;;  %655 = vmatpush.bf16.msra.mxu0 %v1392_v0  ;;  %1401 = vmatpush.bf16.msra.mxu2 %v1392_v0  ;;  %v1399_v3 = vld [vmem:[%s1715_s1 + $0x70] sm:$0xff]  ;;  %v1398_v5 = vld [vmem:[%s1715_s1 + $0x68] sm:$0xff]  ;;  %s1352_s17 = sshll.u32 %s1723_s28, 3 }
   0xe   : > { %744 = vmatpush.bf16.msra.mxu1 %v1400_v1  ;;  %1409 = vmatpush.bf16.msra.mxu3 %v1400_v1  ;;  %v1389_v6 = vld [vmem:[%s1715_s1 + $0x20] sm:$0xff]  ;;  %v1388_v8 = vld [vmem:[%s1715_s1 + $0x18] sm:$0xff]  ;;  %v1387_v10 = vld [vmem:[%s1715_s1 + $0x10] sm:$0xff]  ;;  %s1554_s22 = scalar_lea.vmem %s1714_s0, %s1352_s17  ;;  %s1640_s7 = scalar_lea.vmem %s1717_s3, %s1352_s17 }
   0xf   : > { %v1397_v7 = vld [vmem:[%s1715_s1 + $0x60] sm:$0xff]  ;;  %v1396_v9 = vld [vmem:[%s1715_s1 + $0x58] sm:$0xff]  ;;  %v1395_v11 = vld [vmem:[%s1715_s1 + $0x50] sm:$0xff] }
  0x10   : > { %v1386_v12 = vld [vmem:[%s1715_s1 + $0x8] sm:$0xff]  ;;  %v1385_v14 = vld [vmem:[%s1715_s1] sm:$0xff]  ;;  %v1168_v28 = vld [vmem:[%s1554_s22 + $0x10] sm:$0xf] }
  0x11   : > { %656 = vmatpush.bf16.msra.mxu0 %v1391_v2  ;;  %1402 = vmatpush.bf16.msra.mxu2 %v1391_v2  ;;  %v1394_v13 = vld [vmem:[%s1715_s1 + $0x48] sm:$0xff]  ;;  %v1393_v15 = vld [vmem:[%s1715_s1 + $0x40] sm:$0xff]  ;;  %v1356_v29 = vld [vmem:[%s1554_s22 + $0x14] sm:$0xf0] }
  0x12   : > { %745 = vmatpush.bf16.msra.mxu1 %v1399_v3  ;;  %1410 = vmatpush.bf16.msra.mxu3 %v1399_v3  ;;  %v1160_v16 = vld [vmem:[%s1554_s22] sm:$0xf]  ;;  %v1354_v17 = vld [vmem:[%s1554_s22 + $0x4] sm:$0xf0]  ;;  %v1353_v20 = vld [vmem:[%s1554_s22 + $0x4] sm:$0xf]  ;;  %v1169_v36 = vor.u32 %v1356_v29, %v1168_v28 }
  0x13   : > { %v1224_v18 = vld [vmem:[%s1554_s22 + $0x80] sm:$0xf]  ;;  %v1370_v19 = vld [vmem:[%s1554_s22 + $0x84] sm:$0xf0]  ;;  %v1162_v21 = vld [vmem:[%s1554_s22 + $0x8] sm:$0xf0]  ;;  %v1161_v24 = vor.u32 %v1354_v17, %v1160_v16 }
  0x14   : > { %v1369_v22 = vld [vmem:[%s1554_s22 + $0x84] sm:$0xf]  ;;  %v1226_v23 = vld [vmem:[%s1554_s22 + $0x88] sm:$0xf0]  ;;  %v1225_v25 = vor.u32 %v1370_v19, %v1224_v18  ;;  %v1165_v26 = vor.u32 %v1353_v20, %v1162_v21  ;;  %v1232_v30 = vld [vmem:[%s1554_s22 + $0x90] sm:$0xf] }
  0x15   : > { %657 = vmatpush.bf16.msra.mxu0 %v1390_v4  ;;  %1403 = vmatpush.bf16.msra.mxu2 %v1390_v4  ;;  %v1229_v27 = vor.u32 %v1369_v22, %v1226_v23  ;;  %v1372_v31 = vld [vmem:[%s1554_s22 + $0x94] sm:$0xf0]  ;;  %v1355_v32 = vld [vmem:[%s1554_s22 + $0x14] sm:$0xf]  ;;  %v1170_v33 = vld [vmem:[%s1554_s22 + $0x18] sm:$0xf0] }
  0x16   : > { %746 = vmatpush.bf16.msra.mxu1 %v1398_v5  ;;  %1411 = vmatpush.bf16.msra.mxu3 %v1398_v5  ;;  %v1371_v34 = vld [vmem:[%s1554_s22 + $0x94] sm:$0xf]  ;;  %v1234_v35 = vld [vmem:[%s1554_s22 + $0x98] sm:$0xf0]  ;;  %v1233_v37 = vor.u32 %v1372_v31, %v1232_v30  ;;  %v1173_v38 = vor.u32 %v1355_v32, %v1170_v33  ;;  %v1176_v40 = vld [vmem:[%s1554_s22 + $0x20] sm:$0xf] }
  0x17   : > { %v1237_v39 = vor.u32 %v1371_v34, %v1234_v35  ;;  %v1358_v41 = vld [vmem:[%s1554_s22 + $0x24] sm:$0xf0]  ;;  %v1240_v42 = vld [vmem:[%s1554_s22 + $0xa0] sm:$0xf]  ;;  %v1357_v44 = vld [vmem:[%s1554_s22 + $0x24] sm:$0xf] }
  0x18   : > { %v1374_v43 = vld [vmem:[%s1554_s22 + $0xa4] sm:$0xf0]  ;;  %v1178_v45 = vld [vmem:[%s1554_s22 + $0x28] sm:$0xf0]  ;;  %v1373_v46 = vld [vmem:[%s1554_s22 + $0xa4] sm:$0xf]  ;;  %v1177_v48 = vor.u32 %v1358_v41, %v1176_v40 }
  0x19   : > { %658 = vmatpush.bf16.msra.mxu0 %v1389_v6  ;;  %1404 = vmatpush.bf16.msra.mxu2 %v1389_v6  ;;  %v1242_v47 = vld [vmem:[%s1554_s22 + $0xa8] sm:$0xf0]  ;;  %v1241_v49 = vor.u32 %v1374_v43, %v1240_v42  ;;  %v1181_v50 = vor.u32 %v1357_v44, %v1178_v45  ;;  %v1184_v52 = vld [vmem:[%s1554_s22 + $0x30] sm:$0xf]  ;;  %v1360_v53 = vld [vmem:[%s1554_s22 + $0x34] sm:$0xf0] }
  0x1a   : > { %747 = vmatpush.bf16.msra.mxu1 %v1397_v7  ;;  %1412 = vmatpush.bf16.msra.mxu3 %v1397_v7  ;;  %v1245_v51 = vor.u32 %v1373_v46, %v1242_v47  ;;  %v1248_v54 = vld [vmem:[%s1554_s22 + $0xb0] sm:$0xf]  ;;  %v1376_v55 = vld [vmem:[%s1554_s22 + $0xb4] sm:$0xf0]  ;;  %v1359_v56 = vld [vmem:[%s1554_s22 + $0x34] sm:$0xf]  ;;  %v1185_v60 = vor.u32 %v1360_v53, %v1184_v52 }
  0x1b   : > { %v1186_v57 = vld [vmem:[%s1554_s22 + $0x38] sm:$0xf0]  ;;  %v1375_v58 = vld [vmem:[%s1554_s22 + $0xb4] sm:$0xf]  ;;  %v1249_v61 = vor.u32 %v1376_v55, %v1248_v54  ;;  %v1192_v0 = vld [vmem:[%s1554_s22 + $0x40] sm:$0xf] }
  0x1c   : > { %v1250_v59 = vld [vmem:[%s1554_s22 + $0xb8] sm:$0xf0]  ;;  %v1189_v62 = vor.u32 %v1359_v56, %v1186_v57  ;;  %v1362_v1 = vld [vmem:[%s1554_s22 + $0x44] sm:$0xf0]  ;;  %v1256_v2 = vld [vmem:[%s1554_s22 + $0xc0] sm:$0xf] }
  0x1d   : > { %659 = vmatpush.bf16.msra.mxu0 %v1388_v8  ;;  %1405 = vmatpush.bf16.msra.mxu2 %v1388_v8  ;;  %v1253_v63 = vor.u32 %v1375_v58, %v1250_v59  ;;  %v1378_v3 = vld [vmem:[%s1554_s22 + $0xc4] sm:$0xf0]  ;;  %v1361_v4 = vld [vmem:[%s1554_s22 + $0x44] sm:$0xf]  ;;  %v1194_v5 = vld [vmem:[%s1554_s22 + $0x48] sm:$0xf0]  ;;  %v1193_v8 = vor.u32 %v1362_v1, %v1192_v0 }
  0x1e   : > { %748 = vmatpush.bf16.msra.mxu1 %v1396_v9  ;;  %1413 = vmatpush.bf16.msra.mxu3 %v1396_v9  ;;  %v1377_v6 = vld [vmem:[%s1554_s22 + $0xc4] sm:$0xf]  ;;  %v1258_v7 = vld [vmem:[%s1554_s22 + $0xc8] sm:$0xf0]  ;;  %v1257_v9 = vor.u32 %v1378_v3, %v1256_v2  ;;  %v1363_v16 = vld [vmem:[%s1554_s22 + $0x54] sm:$0xf] }
  0x1f   : > { %v1202_v17 = vld [vmem:[%s1554_s22 + $0x58] sm:$0xf0]  ;;  %v1379_v18 = vld [vmem:[%s1554_s22 + $0xd4] sm:$0xf]  ;;  %v1365_v28 = vld [vmem:[%s1554_s22 + $0x64] sm:$0xf] }
  0x20   : > { %v1266_v19 = vld [vmem:[%s1554_s22 + $0xd8] sm:$0xf0]  ;;  %v1205_v22 = vor.u32 %v1363_v16, %v1202_v17  ;;  %v1210_v29 = vld [vmem:[%s1554_s22 + $0x68] sm:$0xf0]  ;;  %v1381_v30 = vld [vmem:[%s1554_s22 + $0xe4] sm:$0xf] }
  0x21   : > { %660 = vmatpush.bf16.msra.mxu0 %v1387_v10  ;;  %1406 = vmatpush.bf16.msra.mxu2 %v1387_v10  ;;  %v1197_v10 = vor.u32 %v1361_v4, %v1194_v5  ;;  %v1269_v23 = vor.u32 %v1379_v18, %v1266_v19  ;;  %v1274_v31 = vld [vmem:[%s1554_s22 + $0xe8] sm:$0xf0]  ;;  %v1213_v34 = vor.u32 %v1365_v28, %v1210_v29  ;;  %v1367_v40 = vld [vmem:[%s1554_s22 + $0x74] sm:$0xf]  ;;  %v1218_v41 = vld [vmem:[%s1554_s22 + $0x78] sm:$0xf0] }
  0x22   : > { %749 = vmatpush.bf16.msra.mxu1 %v1395_v11  ;;  %1414 = vmatpush.bf16.msra.mxu3 %v1395_v11  ;;  %v1261_v11 = vor.u32 %v1377_v6, %v1258_v7  ;;  %v1277_v35 = vor.u32 %v1381_v30, %v1274_v31  ;;  %v1383_v42 = vld [vmem:[%s1554_s22 + $0xf4] sm:$0xf]  ;;  %v1282_v43 = vld [vmem:[%s1554_s22 + $0xf8] sm:$0xf0]  ;;  %v1221_v46 = vor.u32 %v1367_v40, %v1218_v41 }
  0x23   : > { %v1285_v47 = vor.u32 %v1383_v42, %v1282_v43 }
  0x25   : > { %661 = vmatpush.bf16.msra.mxu0 %v1386_v12  ;;  %1407 = vmatpush.bf16.msra.mxu2 %v1386_v12  ;;  %v1200_v12 = vld [vmem:[%s1554_s22 + $0x50] sm:$0xf] }
  0x26   : > { %750 = vmatpush.bf16.msra.mxu1 %v1394_v13  ;;  %1415 = vmatpush.bf16.msra.mxu3 %v1394_v13  ;;  %v1364_v13 = vld [vmem:[%s1554_s22 + $0x54] sm:$0xf0] }
  0x27   : > { %v1201_v20 = vor.u32 %v1364_v13, %v1200_v12 }
  0x29   : > { %662 = vmatpush.bf16.msra.mxu0 %v1385_v14  ;;  %1408 = vmatpush.bf16.msra.mxu2 %v1385_v14  ;;  %v1264_v14 = vld [vmem:[%s1554_s22 + $0xd0] sm:$0xf] }
  0x2a   : > { %751 = vmatpush.bf16.msra.mxu1 %v1393_v15  ;;  %1416 = vmatpush.bf16.msra.mxu3 %v1393_v15  ;;  %v1380_v15 = vld [vmem:[%s1554_s22 + $0xd4] sm:$0xf0] }
  0x2b   : > { %v1265_v21 = vor.u32 %v1380_v15, %v1264_v14 }
  0x2c   : > { %663 = vmatmul.bf16.vlgmr.msra.gmra.mxu0 %v1161_v24  ;;  %703 = vmatmul.bf16.vlgmr.msra.gmra.mxu2 %v1225_v25  ;;  %v1208_v24 = vld [vmem:[%s1554_s22 + $0x60] sm:$0xf]  ;;  %v1366_v25 = vld [vmem:[%s1554_s22 + $0x64] sm:$0xf0] }
  0x2d   : > { %752 = vmatmul.bf16.vlgmr.msra.gmra.mxu1 %v1165_v26  ;;  %792 = vmatmul.bf16.vlgmr.msra.gmra.mxu3 %v1229_v27  ;;  %v1272_v26 = vld [vmem:[%s1554_s22 + $0xe0] sm:$0xf]  ;;  %v1382_v27 = vld [vmem:[%s1554_s22 + $0xe4] sm:$0xf0]  ;;  %v1209_v32 = vor.u32 %v1366_v25, %v1208_v24 }
  0x2e   : > { %v1273_v33 = vor.u32 %v1382_v27, %v1272_v26 }
  0x3c   : > { %668 = vmatmul.bf16.gmra.mxu0 %v1169_v36  ;;  %708 = vmatmul.bf16.gmra.mxu2 %v1233_v37  ;;  %v1216_v36 = vld [vmem:[%s1554_s22 + $0x70] sm:$0xf]  ;;  %v1368_v37 = vld [vmem:[%s1554_s22 + $0x74] sm:$0xf0] }
  0x3d   : > { %757 = vmatmul.bf16.gmra.mxu1 %v1173_v38  ;;  %797 = vmatmul.bf16.gmra.mxu3 %v1237_v39  ;;  %v1280_v38 = vld [vmem:[%s1554_s22 + $0xf0] sm:$0xf]  ;;  %v1384_v39 = vld [vmem:[%s1554_s22 + $0xf4] sm:$0xf0]  ;;  %v1217_v44 = vor.u32 %v1368_v37, %v1216_v36 }
  0x3e   : > { %v1281_v45 = vor.u32 %v1384_v39, %v1280_v38 }
  0x4c   : > { %673 = vmatmul.bf16.gmra.mxu0 %v1177_v48  ;;  %713 = vmatmul.bf16.gmra.mxu2 %v1241_v49  ;;  %v1632_v49 = vld [vmem:[%s1716_s2] ss:$0 sm:$0xff] }
  0x4d   : > { %762 = vmatmul.bf16.gmra.mxu1 %v1181_v50  ;;  %802 = vmatmul.bf16.gmra.mxu3 %v1245_v51 }
  0x5c   : > { %678 = vmatmul.bf16.gmra.mxu0 %v1185_v60  ;;  %718 = vmatmul.bf16.gmra.mxu2 %v1249_v61 }
  0x5d   : > { %767 = vmatmul.bf16.gmra.mxu1 %v1189_v62  ;;  %807 = vmatmul.bf16.gmra.mxu3 %v1253_v63 }
  0x6c   : > { %683 = vmatmul.bf16.gmra.mxu0 %v1193_v8  ;;  %723 = vmatmul.bf16.gmra.mxu2 %v1257_v9 }
  0x6d   : > { %772 = vmatmul.bf16.gmra.mxu1 %v1197_v10  ;;  %812 = vmatmul.bf16.gmra.mxu3 %v1261_v11 }
  0x7c   : > { %688 = vmatmul.bf16.gmra.mxu0 %v1201_v20  ;;  %728 = vmatmul.bf16.gmra.mxu2 %v1265_v21 }
  0x7d   : > { %777 = vmatmul.bf16.gmra.mxu1 %v1205_v22  ;;  %817 = vmatmul.bf16.gmra.mxu3 %v1269_v23 }
  0x8c   : > { %693 = vmatmul.bf16.gmra.mxu0 %v1209_v32  ;;  %733 = vmatmul.bf16.gmra.mxu2 %v1273_v33 }
  0x8d   : > { %782 = vmatmul.bf16.gmra.mxu1 %v1213_v34  ;;  %822 = vmatmul.bf16.gmra.mxu3 %v1277_v35 }
  0x9c   : > { %698 = vmatmul.bf16.gmra.mxu0 %v1217_v44  ;;  %738 = vmatmul.bf16.gmra.mxu2 %v1281_v45 }
  0x9d   : > { %787 = vmatmul.bf16.gmra.mxu1 %v1221_v46  ;;  %827 = vmatmul.bf16.gmra.mxu3 %v1285_v47 }
  0xa9   : > { %v664_v48 = vpop.f32.mrf.mxu0 }
  0xaa   : > { %v753_v50 = vpop.f32.mrf.mxu1 }
  0xab   : > { %v754_v51 = vadd.f32 %v753_v50, %v664_v48 }
  0xad   : > { %v936_v52 = vadd.f32 %v1632_v49, %v754_v51 }
  0xaf   : > { %v968_v53 = vmax.f32 %v936_v52, 0.0  ;;  %v704_v54 = vpop.f32.mrf.mxu2 }
  0xb0   : > { %v793_v55 = vpop.f32.mrf.mxu3 }
  0xb1   : > { %1000 = vst [vmem:[%s1640_s7] sm:$0xff] %v968_v53  ;;  %v794_v56 = vadd.f32 %v793_v55, %v704_v54  ;;  %v666_v57 = vpop.f32.mrf.mxu0 }
  0xb2   : > { %v755_v58 = vpop.f32.mrf.mxu1 }
  0xb3   : > { %v952_v59 = vadd.f32 %v1632_v49, %v794_v56  ;;  %v756_v60 = vadd.f32 %v755_v58, %v666_v57 }
  0xb5   : > { %v984_v61 = vmax.f32 %v952_v59, 0.0  ;;  %v937_v62 = vadd.f32 %v1632_v49, %v756_v60 }
  0xb7   : > { %1016 = vst [vmem:[%s1640_s7 + $0x80] sm:$0xff] %v984_v61  ;;  %v969_v63 = vmax.f32 %v937_v62, 0.0  ;;  %v706_v0 = vpop.f32.mrf.mxu2 }
  0xb8   : > { %v795_v1 = vpop.f32.mrf.mxu3 }
  0xb9   : > { %1001 = vst [vmem:[%s1640_s7 + $0x8] sm:$0xff] %v969_v63  ;;  %v796_v2 = vadd.f32 %v795_v1, %v706_v0  ;;  %v669_v3 = vpop.f32.mrf.mxu0 }
  0xba   : > { %v758_v4 = vpop.f32.mrf.mxu1 }
  0xbb   : > { %v953_v5 = vadd.f32 %v1632_v49, %v796_v2  ;;  %v759_v6 = vadd.f32 %v758_v4, %v669_v3 }
  0xbd   : > { %v985_v7 = vmax.f32 %v953_v5, 0.0  ;;  %v938_v8 = vadd.f32 %v1632_v49, %v759_v6 }
  0xbf   : > { %1017 = vst [vmem:[%s1640_s7 + $0x88] sm:$0xff] %v985_v7  ;;  %v970_v9 = vmax.f32 %v938_v8, 0.0  ;;  %v709_v10 = vpop.f32.mrf.mxu2 }
  0xc0   : > { %v798_v11 = vpop.f32.mrf.mxu3 }
  0xc1   : > { %1002 = vst [vmem:[%s1640_s7 + $0x10] sm:$0xff] %v970_v9  ;;  %v799_v12 = vadd.f32 %v798_v11, %v709_v10  ;;  %v671_v13 = vpop.f32.mrf.mxu0 }
  0xc2   : > { %v760_v14 = vpop.f32.mrf.mxu1 }
  0xc3   : > { %v954_v15 = vadd.f32 %v1632_v49, %v799_v12  ;;  %v761_v16 = vadd.f32 %v760_v14, %v671_v13 }
  0xc5   : > { %v986_v17 = vmax.f32 %v954_v15, 0.0  ;;  %v939_v18 = vadd.f32 %v1632_v49, %v761_v16 }
  0xc7   : > { %1018 = vst [vmem:[%s1640_s7 + $0x90] sm:$0xff] %v986_v17  ;;  %v971_v19 = vmax.f32 %v939_v18, 0.0  ;;  %v711_v20 = vpop.f32.mrf.mxu2 }
  0xc8   : > { %v800_v21 = vpop.f32.mrf.mxu3 }
  0xc9   : > { %1003 = vst [vmem:[%s1640_s7 + $0x18] sm:$0xff] %v971_v19  ;;  %v801_v22 = vadd.f32 %v800_v21, %v711_v20  ;;  %v674_v23 = vpop.f32.mrf.mxu0 }
  0xca   : > { %v763_v24 = vpop.f32.mrf.mxu1 }
  0xcb   : > { %v955_v25 = vadd.f32 %v1632_v49, %v801_v22  ;;  %v764_v26 = vadd.f32 %v763_v24, %v674_v23 }
  0xcd   : > { %v987_v27 = vmax.f32 %v955_v25, 0.0  ;;  %v940_v28 = vadd.f32 %v1632_v49, %v764_v26 }
  0xcf   : > { %1019 = vst [vmem:[%s1640_s7 + $0x98] sm:$0xff] %v987_v27  ;;  %v972_v29 = vmax.f32 %v940_v28, 0.0  ;;  %v714_v30 = vpop.f32.mrf.mxu2 }
  0xd0   : > { %v803_v31 = vpop.f32.mrf.mxu3 }
  0xd1   : > { %1004 = vst [vmem:[%s1640_s7 + $0x20] sm:$0xff] %v972_v29  ;;  %v804_v32 = vadd.f32 %v803_v31, %v714_v30  ;;  %v676_v33 = vpop.f32.mrf.mxu0 }
  0xd2   : > { %v765_v34 = vpop.f32.mrf.mxu1 }
  0xd3   : > { %v956_v35 = vadd.f32 %v1632_v49, %v804_v32  ;;  %v766_v36 = vadd.f32 %v765_v34, %v676_v33 }
  0xd5   : > { %v988_v37 = vmax.f32 %v956_v35, 0.0  ;;  %v941_v38 = vadd.f32 %v1632_v49, %v766_v36 }
  0xd7   : > { %1020 = vst [vmem:[%s1640_s7 + $0xa0] sm:$0xff] %v988_v37  ;;  %v973_v39 = vmax.f32 %v941_v38, 0.0  ;;  %v716_v40 = vpop.f32.mrf.mxu2 }
  0xd8   : > { %v805_v41 = vpop.f32.mrf.mxu3 }
  0xd9   : > { %1005 = vst [vmem:[%s1640_s7 + $0x28] sm:$0xff] %v973_v39  ;;  %v806_v42 = vadd.f32 %v805_v41, %v716_v40  ;;  %v679_v43 = vpop.f32.mrf.mxu0 }
  0xda   : > { %v768_v44 = vpop.f32.mrf.mxu1 }
  0xdb   : > { %v957_v45 = vadd.f32 %v1632_v49, %v806_v42  ;;  %v769_v46 = vadd.f32 %v768_v44, %v679_v43 }
  0xdd   : > { %v989_v47 = vmax.f32 %v957_v45, 0.0  ;;  %v942_v48 = vadd.f32 %v1632_v49, %v769_v46 }
  0xdf   : > { %1021 = vst [vmem:[%s1640_s7 + $0xa8] sm:$0xff] %v989_v47  ;;  %v974_v50 = vmax.f32 %v942_v48, 0.0  ;;  %v719_v51 = vpop.f32.mrf.mxu2 }
  0xe0   : > { %v808_v52 = vpop.f32.mrf.mxu3 }
  0xe1   : > { %1006 = vst [vmem:[%s1640_s7 + $0x30] sm:$0xff] %v974_v50  ;;  %v809_v53 = vadd.f32 %v808_v52, %v719_v51  ;;  %v681_v54 = vpop.f32.mrf.mxu0 }
  0xe2   : > { %v770_v55 = vpop.f32.mrf.mxu1 }
  0xe3   : > { %v958_v56 = vadd.f32 %v1632_v49, %v809_v53  ;;  %v771_v57 = vadd.f32 %v770_v55, %v681_v54 }
  0xe5   : > { %v990_v58 = vmax.f32 %v958_v56, 0.0  ;;  %v943_v59 = vadd.f32 %v1632_v49, %v771_v57 }
  0xe7   : > { %1022 = vst [vmem:[%s1640_s7 + $0xb0] sm:$0xff] %v990_v58  ;;  %v975_v60 = vmax.f32 %v943_v59, 0.0  ;;  %v721_v61 = vpop.f32.mrf.mxu2 }
  0xe8   : > { %v810_v62 = vpop.f32.mrf.mxu3 }
  0xe9   : > { %1007 = vst [vmem:[%s1640_s7 + $0x38] sm:$0xff] %v975_v60  ;;  %v811_v63 = vadd.f32 %v810_v62, %v721_v61  ;;  %v684_v0 = vpop.f32.mrf.mxu0 }
  0xea   : > { %v773_v1 = vpop.f32.mrf.mxu1 }
  0xeb   : > { %v959_v2 = vadd.f32 %v1632_v49, %v811_v63  ;;  %v774_v3 = vadd.f32 %v773_v1, %v684_v0 }
  0xed   : > { %v991_v4 = vmax.f32 %v959_v2, 0.0  ;;  %v944_v5 = vadd.f32 %v1632_v49, %v774_v3 }
  0xef   : > { %1023 = vst [vmem:[%s1640_s7 + $0xb8] sm:$0xff] %v991_v4  ;;  %v976_v6 = vmax.f32 %v944_v5, 0.0  ;;  %v724_v7 = vpop.f32.mrf.mxu2 }
  0xf0   : > { %v813_v8 = vpop.f32.mrf.mxu3 }
  0xf1   : > { %1008 = vst [vmem:[%s1640_s7 + $0x40] sm:$0xff] %v976_v6  ;;  %v814_v9 = vadd.f32 %v813_v8, %v724_v7  ;;  %v686_v10 = vpop.f32.mrf.mxu0 }
  0xf2   : > { %v775_v11 = vpop.f32.mrf.mxu1 }
  0xf3   : > { %v960_v12 = vadd.f32 %v1632_v49, %v814_v9  ;;  %v776_v13 = vadd.f32 %v775_v11, %v686_v10 }
  0xf5   : > { %v992_v14 = vmax.f32 %v960_v12, 0.0  ;;  %v945_v15 = vadd.f32 %v1632_v49, %v776_v13 }
  0xf7   : > { %1024 = vst [vmem:[%s1640_s7 + $0xc0] sm:$0xff] %v992_v14  ;;  %v977_v16 = vmax.f32 %v945_v15, 0.0  ;;  %v726_v17 = vpop.f32.mrf.mxu2 }
  0xf8   : > { %v815_v18 = vpop.f32.mrf.mxu3 }
  0xf9   : > { %1009 = vst [vmem:[%s1640_s7 + $0x48] sm:$0xff] %v977_v16  ;;  %v816_v19 = vadd.f32 %v815_v18, %v726_v17  ;;  %v689_v20 = vpop.f32.mrf.mxu0 }
  0xfa   : > { %v778_v21 = vpop.f32.mrf.mxu1 }
  0xfb   : > { %v961_v22 = vadd.f32 %v1632_v49, %v816_v19  ;;  %v779_v23 = vadd.f32 %v778_v21, %v689_v20 }
  0xfd   : > { %v993_v24 = vmax.f32 %v961_v22, 0.0  ;;  %v946_v25 = vadd.f32 %v1632_v49, %v779_v23 }
  0xff   : > { %1025 = vst [vmem:[%s1640_s7 + $0xc8] sm:$0xff] %v993_v24  ;;  %v978_v26 = vmax.f32 %v946_v25, 0.0  ;;  %v729_v27 = vpop.f32.mrf.mxu2 }
 0x100   : > { %v818_v28 = vpop.f32.mrf.mxu3 }
 0x101   : > { %1010 = vst [vmem:[%s1640_s7 + $0x50] sm:$0xff] %v978_v26  ;;  %v819_v29 = vadd.f32 %v818_v28, %v729_v27  ;;  %v691_v30 = vpop.f32.mrf.mxu0 }
 0x102   : > { %v780_v31 = vpop.f32.mrf.mxu1 }
 0x103   : > { %v962_v32 = vadd.f32 %v1632_v49, %v819_v29  ;;  %v781_v33 = vadd.f32 %v780_v31, %v691_v30 }
 0x105   : > { %v994_v34 = vmax.f32 %v962_v32, 0.0  ;;  %v947_v35 = vadd.f32 %v1632_v49, %v781_v33 }
 0x107   : > { %1026 = vst [vmem:[%s1640_s7 + $0xd0] sm:$0xff] %v994_v34  ;;  %v979_v36 = vmax.f32 %v947_v35, 0.0  ;;  %v731_v37 = vpop.f32.mrf.mxu2 }
 0x108   : > { %v820_v38 = vpop.f32.mrf.mxu3 }
 0x109   : > { %1011 = vst [vmem:[%s1640_s7 + $0x58] sm:$0xff] %v979_v36  ;;  %v821_v39 = vadd.f32 %v820_v38, %v731_v37  ;;  %v694_v40 = vpop.f32.mrf.mxu0 }
 0x10a   : > { %v783_v41 = vpop.f32.mrf.mxu1 }
 0x10b   : > { %v963_v42 = vadd.f32 %v1632_v49, %v821_v39  ;;  %v784_v43 = vadd.f32 %v783_v41, %v694_v40 }
 0x10d   : > { %v995_v44 = vmax.f32 %v963_v42, 0.0  ;;  %v948_v45 = vadd.f32 %v1632_v49, %v784_v43 }
 0x10f   : > { %1027 = vst [vmem:[%s1640_s7 + $0xd8] sm:$0xff] %v995_v44  ;;  %v980_v46 = vmax.f32 %v948_v45, 0.0  ;;  %v734_v47 = vpop.f32.mrf.mxu2 }
 0x110   : > { %v823_v48 = vpop.f32.mrf.mxu3 }
 0x111   : > { %1012 = vst [vmem:[%s1640_s7 + $0x60] sm:$0xff] %v980_v46  ;;  %v824_v50 = vadd.f32 %v823_v48, %v734_v47  ;;  %v696_v51 = vpop.f32.mrf.mxu0 }
 0x112   : > { %v785_v52 = vpop.f32.mrf.mxu1 }
 0x113   : > { %v964_v53 = vadd.f32 %v1632_v49, %v824_v50  ;;  %v786_v54 = vadd.f32 %v785_v52, %v696_v51 }
 0x115   : > { %v996_v55 = vmax.f32 %v964_v53, 0.0  ;;  %v949_v56 = vadd.f32 %v1632_v49, %v786_v54 }
 0x117   : > { %1028 = vst [vmem:[%s1640_s7 + $0xe0] sm:$0xff] %v996_v55  ;;  %v981_v57 = vmax.f32 %v949_v56, 0.0  ;;  %v736_v58 = vpop.f32.mrf.mxu2 }
 0x118   : > { %v825_v59 = vpop.f32.mrf.mxu3 }
 0x119   : > { %1013 = vst [vmem:[%s1640_s7 + $0x68] sm:$0xff] %v981_v57  ;;  %v826_v60 = vadd.f32 %v825_v59, %v736_v58  ;;  %v699_v61 = vpop.f32.mrf.mxu0 }
 0x11a   : > { %v788_v62 = vpop.f32.mrf.mxu1 }
 0x11b   : > { %v965_v63 = vadd.f32 %v1632_v49, %v826_v60  ;;  %v789_v0 = vadd.f32 %v788_v62, %v699_v61 }
 0x11d   : > { %v997_v1 = vmax.f32 %v965_v63, 0.0  ;;  %v950_v2 = vadd.f32 %v1632_v49, %v789_v0 }
 0x11f   : > { %1029 = vst [vmem:[%s1640_s7 + $0xe8] sm:$0xff] %v997_v1  ;;  %v982_v3 = vmax.f32 %v950_v2, 0.0  ;;  %v739_v4 = vpop.f32.mrf.mxu2 }
 0x120   : > { %v828_v5 = vpop.f32.mrf.mxu3 }
 0x121   : > { %1014 = vst [vmem:[%s1640_s7 + $0x70] sm:$0xff] %v982_v3  ;;  %v829_v6 = vadd.f32 %v828_v5, %v739_v4  ;;  %v701_v7 = vpop.f32.mrf.mxu0 }
 0x122   : > { %v790_v8 = vpop.f32.mrf.mxu1 }
 0x123   : > { %v966_v9 = vadd.f32 %v1632_v49, %v829_v6  ;;  %v791_v10 = vadd.f32 %v790_v8, %v701_v7 }
 0x125   : > { %v998_v11 = vmax.f32 %v966_v9, 0.0  ;;  %v951_v12 = vadd.f32 %v1632_v49, %v791_v10 }
 0x127   : > { %1030 = vst [vmem:[%s1640_s7 + $0xf0] sm:$0xff] %v998_v11  ;;  %v983_v13 = vmax.f32 %v951_v12, 0.0  ;;  %v741_v14 = vpop.f32.mrf.mxu2 }
 0x128   : > { %v830_v15 = vpop.f32.mrf.mxu3 }
 0x129   : > { %1015 = vst [vmem:[%s1640_s7 + $0x78] sm:$0xff] %v983_v13  ;;  %v831_v16 = vadd.f32 %v830_v15, %v741_v14 }
 0x12b   : > { %v967_v17 = vadd.f32 %v1632_v49, %v831_v16 }
 0x12d   : > { %v999_v18 = vmax.f32 %v967_v17, 0.0 }
 0x12f   : > { %1031 = vst [vmem:[%s1640_s7 + $0xf8] sm:$0xff] %v999_v18 }
 0x130 PF: > { %s13_s14 = sadd.s32 1, %s1464_s14   ;;  %s1718_s12 = smov %s1460_s13 }
 0x131   : > { %p10_p5 = scmp.ge.s32.totalorder %s13_s14, 4   ;;  %s1719_s13 = smov %s1721_s15 }
 0x133   :  { %12 = sbr.rel (!%p10_p5) target bundleno = 2 (0x2), region = 76 }

</bundles_post_ra>
